<compile_context>
chip_gen: v7x
topology: tpu7x:2x2x1
jax: 0.10.0
libtpu: 0.0.40
codegen_flags: <defaults>
</compile_context>

<pallas_src>
import functools

import jax
import jax.numpy as jnp
from jax.experimental import pallas as pl
from jax.experimental.pallas import tpu as pltpu


def _round_up(n, m):
    return ((n + m - 1) // m) * m


def mlp_kernel(xt_ref, w1_ref, b1_ref, w2_ref, b2_ref, w3_ref, b3_ref, o_ref):
    """One batch tile. Batch lives in the LANE dim of every intermediate.

    xt_ref: (D, TILE_B)   compute dtype (bf16 or f32), lane-dense
    w1_ref: (Hp, D)       compute dtype (PyTorch (out, in) layout)
    w2_ref: (Hp, Hp)      compute dtype
    b1/b2 : (Hp, 1)       f32
    w3    : (Hp, 1)       f32
    b3    : (1, 1)        f32 in SMEM
    o_ref : (1, TILE_B)   f32 (lane-dense)
    """
    xt = xt_ref[...]                                           # (D, TILE_B)

    # h1^T = W1 @ x^T -> (Hp, TILE_B); plain MXU matmul, f32 accumulation.
    h1 = jnp.dot(w1_ref[...], xt, preferred_element_type=jnp.float32)
    h1 = jnp.maximum(h1 + b1_ref[...], 0.0)                    # bias + ReLU in f32
    h1 = h1.astype(w2_ref.dtype)                               # back to MXU input dtype

    # h2^T = W2 @ h1^T -> (Hp, TILE_B)
    h2 = jnp.dot(w2_ref[...], h1, preferred_element_type=jnp.float32)
    h2 = jnp.maximum(h2 + b2_ref[...], 0.0)                    # (Hp, TILE_B), f32

    # Final Linear(Hp, 1): VPU multiply + sublane (XLU) reduce instead of a
    # degenerate N=1 MXU matmul. Result is lane-dense (1, TILE_B).
    out = jnp.sum(h2 * w3_ref[...], axis=0, keepdims=True) + b3_ref[0, 0]
    o_ref[...] = out.astype(o_ref.dtype)


def prepare_params(params, *, compute_dtype=jnp.bfloat16):
    """Pad hidden dim only to the dtype sublane multiple; cast MXU operands.

    bf16 is MXU-safe on v5e/v6e/v7x (f32 accumulation + f32 elementwise keeps
    the kernel v5e-compatible).
    """
    w1, b1, w2, b2, w3, b3 = params       # PyTorch nn.Linear layout
    H, D = w1.shape
    sublane = 16 if jnp.dtype(compute_dtype).itemsize == 2 else 8
    Hp = _round_up(H, sublane)
    ph = Hp - H
    w1p = jnp.pad(w1, ((0, ph), (0, 0))).astype(compute_dtype)                 # (Hp, D)
    b1p = jnp.pad(b1, (0, ph)).reshape(Hp, 1).astype(jnp.float32)              # (Hp, 1)
    w2p = jnp.pad(w2, ((0, ph), (0, ph))).astype(compute_dtype)                # (Hp, Hp)
    b2p = jnp.pad(b2, (0, ph)).reshape(Hp, 1).astype(jnp.float32)              # (Hp, 1)
    w3p = jnp.pad(w3.reshape(H), (0, ph)).reshape(Hp, 1).astype(jnp.float32)   # (Hp, 1)
    b3p = jnp.asarray(b3, jnp.float32).reshape(1, 1)                           # (1, 1) -> SMEM
    return (w1p, b1p, w2p, b2p, w3p, b3p)


def _choose_tile_b(B, max_tile=8192):
    """Pick the batch tile: >=2 even tiles when possible (v7x megacore), big
    tiles (<= max_tile) to amortize per-grid-step overhead, 128-aligned."""
    B128 = _round_up(B, 128)
    if B128 <= 128:
        return 128
    n = max(2, pl.cdiv(B128, max_tile))
    if n % 2:
        n += 1                       # even tile count -> both TCs get equal work
    return max(128, _round_up(pl.cdiv(B, n), 128))


@jax.jit
def mlp_forward(x, kernel_params):
    """x: (B, D) float. Returns (B,) f32, matching MLP(x).squeeze(-1)."""
    w1, b1, w2, b2, w3, b3 = kernel_params
    Hp, D = w1.shape
    compute_dtype = w1.dtype
    B = x.shape[0]

    tile_b = _choose_tile_b(B)
    B_pad = _round_up(B, tile_b)

    # Transpose to (D, B) so the x tile is lane-dense, then zero-pad the batch.
    xt = jnp.transpose(x.astype(compute_dtype))                # (D, B)
    if B_pad != B:
        xt = jnp.pad(xt, ((0, 0), (0, B_pad - B)))
    num_tiles = B_pad // tile_b

    itemsize = jnp.dtype(compute_dtype).itemsize
    param_bytes = sum(int(p.size) * p.dtype.itemsize for p in kernel_params)
    cost = pl.CostEstimate(
        flops=2 * B_pad * (D * Hp + Hp * Hp + Hp),
        transcendentals=0,
        bytes_accessed=B_pad * D * itemsize + B_pad * 4 + param_bytes,
    )

    out = pl.pallas_call(
        mlp_kernel,
        out_shape=jax.ShapeDtypeStruct((1, B_pad), jnp.float32),
        grid_spec=pltpu.PrefetchScalarGridSpec(
            num_scalar_prefetch=0,
            grid=(num_tiles,),
            in_specs=[
                pl.BlockSpec((D, tile_b), lambda i: (0, i)),        # x^T tile (lane-dense)
                pl.BlockSpec((Hp, D), lambda i: (0, 0)),            # w1 (resident)
                pl.BlockSpec((Hp, 1), lambda i: (0, 0)),            # b1 (resident)
                pl.BlockSpec((Hp, Hp), lambda i: (0, 0)),           # w2 (resident)
                pl.BlockSpec((Hp, 1), lambda i: (0, 0)),            # b2 (resident)
                pl.BlockSpec((Hp, 1), lambda i: (0, 0)),            # w3 (resident)
                pl.BlockSpec(memory_space=pltpu.MemorySpace.SMEM),  # b3 scalar
            ],
            out_specs=pl.BlockSpec((1, tile_b), lambda i: (0, i)),  # lane-dense
        ),
        compiler_params=pltpu.CompilerParams(
            dimension_semantics=("parallel",),   # shard batch tiles across TCs (v7x)
        ),
        cost_estimate=cost,
    )(xt, w1, b1, w2, b2, w3, b3)

    return out[0, :B]  # squeeze(-1) + drop batch padding


def init_params(key, input_dim, hidden=64):
    """Deterministic synthetic init, PyTorch nn.Linear layout: (out, in), (out,)."""
    k1, k2, k3, k4, k5, k6 = jax.random.split(key, 6)
    w1 = jax.random.normal(k1, (hidden, input_dim), jnp.float32) / jnp.sqrt(input_dim)
    b1 = jax.random.normal(k2, (hidden,), jnp.float32) * 0.01
    w2 = jax.random.normal(k3, (hidden, hidden), jnp.float32) / jnp.sqrt(hidden)
    b2 = jax.random.normal(k4, (hidden,), jnp.float32) * 0.01
    w3 = jax.random.normal(k5, (1, hidden), jnp.float32) / jnp.sqrt(hidden)
    b3 = jax.random.normal(k6, (1,), jnp.float32) * 0.01
    return (w1, b1, w2, b2, w3, b3)


def mlp_reference(x, params, compute_dtype=jnp.float32):
    """Pure-JAX reference (same cast points as the kernel) for correctness."""
    w1, b1, w2, b2, w3, b3 = params
    xc = x.astype(compute_dtype)
    h = jnp.dot(xc, w1.T.astype(compute_dtype), preferred_element_type=jnp.float32) + b1
    h = jnp.maximum(h, 0.0).astype(compute_dtype)
    h = jnp.dot(h, w2.T.astype(compute_dtype), preferred_element_type=jnp.float32) + b2
    h = jnp.maximum(h, 0.0)
    out = jnp.dot(h, w3.T, preferred_element_type=jnp.float32) + b3
    return out[:, 0]


if __name__ == "__main__":
    key = jax.random.PRNGKey(0)
    k_x, k_p, k_x2 = jax.random.split(key, 3)

    batch, input_dim, hidden = 8, 32, 64
    x = jax.random.normal(k_x, (batch, input_dim), jnp.float32)
    params = init_params(k_p, input_dim, hidden)

    # f32 MXU inputs — tight correctness check.
    kp_f32 = prepare_params(params, compute_dtype=jnp.float32)
    y_f32 = jax.block_until_ready(mlp_forward(x, kp_f32))
    ref_f32 = mlp_reference(x, params, compute_dtype=jnp.float32)
    assert y_f32.shape == (batch,)
    assert jnp.allclose(y_f32, ref_f32, atol=1e-4, rtol=1e-4), "f32 mismatch vs reference"

    # bf16 MXU inputs, f32 accumulation (default for all chips) — matched-cast check.
    kp_bf16 = prepare_params(params, compute_dtype=jnp.bfloat16)
    y_bf16 = jax.block_until_ready(mlp_forward(x, kp_bf16))
    ref_bf16 = mlp_reference(x, params, compute_dtype=jnp.bfloat16)
    assert y_bf16.shape == (batch,)
    assert jnp.allclose(y_bf16, ref_bf16, atol=5e-2, rtol=5e-2), "bf16 mismatch vs reference"

    # Multi-tile path (>=2 even tiles, non-multiple batch) — exercises padding/grid.
    batch2 = 300
    x2 = jax.random.normal(k_x2, (batch2, input_dim), jnp.float32)
    y2 = jax.block_until_ready(mlp_forward(x2, kp_f32))
    ref2 = mlp_reference(x2, params, compute_dtype=jnp.float32)
    assert y2.shape == (batch2,)
    assert jnp.allclose(y2, ref2, atol=1e-4, rtol=1e-4), "multi-tile f32 mismatch vs reference"

    print("KERNEL_OK")
</pallas_src>

<mosaic_0001>
module attributes {stable_mosaic.version = 11 : i64} {
  func.func @mlp_kernel(%arg0: i32, %arg1: memref<32x128xf32, #tpu.memory_space<vmem>>, %arg2: memref<64x32xf32, #tpu.memory_space<vmem>>, %arg3: memref<64x1xf32, #tpu.memory_space<vmem>>, %arg4: memref<64x64xf32, #tpu.memory_space<vmem>>, %arg5: memref<64x1xf32, #tpu.memory_space<vmem>>, %arg6: memref<64x1xf32, #tpu.memory_space<vmem>>, %arg7: memref<1x1xf32, #tpu.memory_space<smem>>, %arg8: memref<1x128xf32, #tpu.memory_space<vmem>>) attributes {dimension_semantics = [#tpu.dimension_semantics<parallel>], iteration_bounds = array<i64: 1>, scalar_prefetch = 0 : i64, scratch_operands = 0 : i64, tpu.core_type = #tpu.core_type<tc>, window_params = [{transform_indices = @transform_0, window_bounds = array<i64: 32, 128>}, {pipeline_mode = #tpu.pipeline_mode<synchronous>, transform_indices = @transform_1, window_bounds = array<i64: 64, 32>}, {pipeline_mode = #tpu.pipeline_mode<synchronous>, transform_indices = @transform_2, window_bounds = array<i64: 64, 1>}, {pipeline_mode = #tpu.pipeline_mode<synchronous>, transform_indices = @transform_3, window_bounds = array<i64: 64, 64>}, {pipeline_mode = #tpu.pipeline_mode<synchronous>, transform_indices = @transform_4, window_bounds = array<i64: 64, 1>}, {pipeline_mode = #tpu.pipeline_mode<synchronous>, transform_indices = @transform_5, window_bounds = array<i64: 64, 1>}, {transform_indices = @transform_6, window_bounds = array<i64: 1, 1>}, {transform_indices = @transform_7, window_bounds = array<i64: 1, 128>}]} {
    %c0 = arith.constant 0 : index
    %c0_0 = arith.constant 0 : index
    %0 = vector.load %arg1[%c0, %c0_0] : memref<32x128xf32, #tpu.memory_space<vmem>>, vector<32x128xf32>
    %c0_1 = arith.constant 0 : index
    %c0_2 = arith.constant 0 : index
    %1 = vector.load %arg2[%c0_1, %c0_2] : memref<64x32xf32, #tpu.memory_space<vmem>>, vector<64x32xf32>
    %cst = arith.constant dense<0.000000e+00> : vector<64x128xf32>
    %2 = tpu.matmul %1, %0, %cst {dimension_numbers = #tpu.dot_dimension_numbers<[1], [0], [0], [1], [0, 0, 1, 1], [], []>} : vector<64x32xf32>, vector<32x128xf32>, vector<64x128xf32> -> vector<64x128xf32>
    %c0_3 = arith.constant 0 : index
    %c0_4 = arith.constant 0 : index
    %3 = vector.load %arg3[%c0_3, %c0_4] : memref<64x1xf32, #tpu.memory_space<vmem>>, vector<64x1xf32>
    %4 = vector.broadcast %3 : vector<64x1xf32> to vector<64x128xf32>
    %5 = arith.addf %2, %4 : vector<64x128xf32>
    %cst_5 = arith.constant 0.000000e+00 : f32
    %6 = vector.broadcast %cst_5 : f32 to vector<64x128xf32>
    %7 = arith.maximumf %5, %6 : vector<64x128xf32>
    %c0_6 = arith.constant 0 : index
    %c0_7 = arith.constant 0 : index
    %8 = vector.load %arg4[%c0_6, %c0_7] : memref<64x64xf32, #tpu.memory_space<vmem>>, vector<64x64xf32>
    %cst_8 = arith.constant dense<0.000000e+00> : vector<64x128xf32>
    %9 = tpu.matmul %8, %7, %cst_8 {dimension_numbers = #tpu.dot_dimension_numbers<[1], [0], [0], [1], [0, 0, 1, 1], [], []>} : vector<64x64xf32>, vector<64x128xf32>, vector<64x128xf32> -> vector<64x128xf32>
    %c0_9 = arith.constant 0 : index
    %c0_10 = arith.constant 0 : index
    %10 = vector.load %arg5[%c0_9, %c0_10] : memref<64x1xf32, #tpu.memory_space<vmem>>, vector<64x1xf32>
    %11 = vector.broadcast %10 : vector<64x1xf32> to vector<64x128xf32>
    %12 = arith.addf %9, %11 : vector<64x128xf32>
    %cst_11 = arith.constant 0.000000e+00 : f32
    %13 = vector.broadcast %cst_11 : f32 to vector<64x128xf32>
    %14 = arith.maximumf %12, %13 : vector<64x128xf32>
    %c0_12 = arith.constant 0 : index
    %c0_13 = arith.constant 0 : index
    %15 = vector.load %arg6[%c0_12, %c0_13] : memref<64x1xf32, #tpu.memory_space<vmem>>, vector<64x1xf32>
    %16 = vector.broadcast %15 : vector<64x1xf32> to vector<64x128xf32>
    %17 = arith.mulf %14, %16 : vector<64x128xf32>
    %cst_14 = arith.constant dense<0.000000e+00> : vector<128xf32>
    %18 = vector.multi_reduction <add>, %17, %cst_14 [0] : vector<64x128xf32> to vector<128xf32>
    %19 = vector.shape_cast %18 : vector<128xf32> to vector<1x128xf32>
    %c0_15 = arith.constant 0 : index
    %c0_16 = arith.constant 0 : index
    %20 = memref.load %arg7[%c0_15, %c0_16] : memref<1x1xf32, #tpu.memory_space<smem>>
    %21 = vector.broadcast %20 : f32 to vector<1x128xf32>
    %22 = arith.addf %19, %21 : vector<1x128xf32>
    %c0_17 = arith.constant 0 : index
    %c0_18 = arith.constant 0 : index
    %23 = vector.load %arg8[%c0_17, %c0_18] : memref<1x128xf32, #tpu.memory_space<vmem>>, vector<1x128xf32>
    tpu.vector_store %arg8[%c0_17, %c0_18], %22 {strides = array<i32>} : memref<1x128xf32, #tpu.memory_space<vmem>>, vector<1x128xf32>,
    return
  }
  func.func @transform_0(%arg0: i32) -> (i32, i32) {
    %c0_i32 = arith.constant 0 : i32
    %c0_i32_0 = arith.constant 0 : i32
    return %c0_i32, %arg0 : i32, i32
  }
  func.func @transform_1(%arg0: i32) -> (i32, i32) {
    %c0_i32 = arith.constant 0 : i32
    %c0_i32_0 = arith.constant 0 : i32
    %c0_i32_1 = arith.constant 0 : i32
    return %c0_i32, %c0_i32_0 : i32, i32
  }
  func.func @transform_2(%arg0: i32) -> (i32, i32) {
    %c0_i32 = arith.constant 0 : i32
    %c0_i32_0 = arith.constant 0 : i32
    %c0_i32_1 = arith.constant 0 : i32
    return %c0_i32, %c0_i32_0 : i32, i32
  }
  func.func @transform_3(%arg0: i32) -> (i32, i32) {
    %c0_i32 = arith.constant 0 : i32
    %c0_i32_0 = arith.constant 0 : i32
    %c0_i32_1 = arith.constant 0 : i32
    return %c0_i32, %c0_i32_0 : i32, i32
  }
  func.func @transform_4(%arg0: i32) -> (i32, i32) {
    %c0_i32 = arith.constant 0 : i32
    %c0_i32_0 = arith.constant 0 : i32
    %c0_i32_1 = arith.constant 0 : i32
    return %c0_i32, %c0_i32_0 : i32, i32
  }
  func.func @transform_5(%arg0: i32) -> (i32, i32) {
    %c0_i32 = arith.constant 0 : i32
    %c0_i32_0 = arith.constant 0 : i32
    %c0_i32_1 = arith.constant 0 : i32
    return %c0_i32, %c0_i32_0 : i32, i32
  }
  func.func @transform_6(%arg0: i32) -> (i32, i32) {
    %c0_i32 = arith.constant 0 : i32
    %c0_i32_0 = arith.constant 0 : i32
    %c0_i32_1 = arith.constant 0 : i32
    return %c0_i32, %c0_i32_0 : i32, i32
  }
  func.func @transform_7(%arg0: i32) -> (i32, i32) {
    %c0_i32 = arith.constant 0 : i32
    %c0_i32_0 = arith.constant 0 : i32
    return %c0_i32, %arg0 : i32, i32
  }
}

</mosaic_0001>

<bundles_post_ra>
// kernel: mlp_forward.1
= control target key start
LH: loop header
LB: loop body
LE: loop exit
PB: predicated region body
PF: predicated region fallthrough
CT: control target
= control target key end

     0   :  { %vm87_vm0 = vcmask 261120   ;;  %v623_v3 = vmov 0   ;;  %vm281_vm1 = vcmask 523264   ;;  %s818_s0 = inlined_call_operand.vmem [shape: f32[32,128], index: 0, kind: input, shape index: {}]   ;;  %s819_s1 = inlined_call_operand.vmem [shape: f32[64,32], index: 1, kind: input, shape index: {}]   ;;  %s820_s2 = inlined_call_operand.vmem [shape: f32[64,1], index: 2, kind: input, shape index: {}]   ;;  %s821_s4 = inlined_call_operand.vmem [shape: f32[64,1], index: 4, kind: input, shape index: {}]   ;;  %s822_s5 = inlined_call_operand.vmem [shape: f32[64,1], index: 5, kind: input, shape index: {}]   ;;  %s823_s3 = inlined_call_operand.vmem [shape: f32[64,64], index: 3, kind: input, shape index: {}]   ;;  %s824_s6 = inlined_call_operand.<no memory space> [shape: f32[1,1], index: 6, kind: input, shape index: {}]   ;;  %s825_s7 = inlined_call_operand.vmem [shape: f32[1,128], index: 7, kind: output, shape index: {}]  }
   0x1   :  { %v27_v0 = vld [vmem:[%s818_s0] sm:$0xff]  ;;  %v28_v1 = vld [vmem:[%s818_s0 + $0x8] sm:$0xff]  ;;  %v29_v2 = vld [vmem:[%s818_s0 + $0x10] sm:$0xff]  ;;  %621 = vset.pattern.permute.xlu0 %v623_v3  ;;  %622 = vset.pattern.permute.xlu1 %v623_v3 }
   0x2   :  { %v588_v4 = vpack.c.bf16 %v28_v1, %v27_v0  ;;  %v30_v5 = vld [vmem:[%s818_s0 + $0x18] sm:$0xff]  ;;  %v31_v6 = vld [vmem:[%s819_s1] sm:$0xff]  ;;  %v41_v9 = vld [vmem:[%s820_s2 + $0x10] sm:$0xff] }
   0x3   :  { %v592_v7 = vpack.c.bf16 %v30_v5, %v29_v2  ;;  %548 = vmatprep.mubr.msk.f32.mxu0 %vm87_vm0, %v31_v6  ;;  %v39_v8 = vld [vmem:[%s820_s2] sm:$0xff]  ;;  %59 = vperm.xlu1 %622, %v41_v9   ;;  %v40_v10 = vld [vmem:[%s820_s2 + $0x8] sm:$0xff]  ;;  %v42_v11 = vld [vmem:[%s820_s2 + $0x18] sm:$0xff] }
   0x4   :  { %589 = vmatprep.subr.bf16.mxu0 %v588_v4  ;;  %49 = vperm.xlu0 %621, %v39_v8   ;;  %v32_v12 = vld [vmem:[%s819_s1 + $0x8] sm:$0xff]  ;;  %v33_v13 = vld [vmem:[%s819_s1 + $0x10] sm:$0xff]  ;;  %v43_v14 = vld [vmem:[%s820_s2 + $0x20] sm:$0xff] }
   0x5   :  { %591 = vmatpush3.bf16.msra.mxu0 %v588_v4  ;;  %v44_v15 = vld [vmem:[%s820_s2 + $0x28] sm:$0xff]  ;;  %v34_v16 = vld [vmem:[%s819_s1 + $0x18] sm:$0xff]  ;;  %v35_v17 = vld [vmem:[%s819_s1 + $0x20] sm:$0xff] }
   0x6   :  { %593 = vmatprep.subr.bf16.mxu0 %v592_v7  ;;  %v45_v18 = vld [vmem:[%s820_s2 + $0x30] sm:$0xff]  ;;  %v46_v19 = vld [vmem:[%s820_s2 + $0x38] sm:$0xff]  ;;  %v36_v20 = vld [vmem:[%s819_s1 + $0x28] sm:$0xff] }
   0x7   :  { %64 = vperm.xlu1 %622, %v42_v11   ;;  %v37_v21 = vld [vmem:[%s819_s1 + $0x30] sm:$0xff]  ;;  %v233_v22 = vld [vmem:[%s821_s4] sm:$0xff]  ;;  %v234_v23 = vld [vmem:[%s821_s4 + $0x8] sm:$0xff] }
   0x8   :  { %54 = vperm.xlu0 %621, %v40_v10   ;;  %v38_v24 = vld [vmem:[%s819_s1 + $0x38] sm:$0xff]  ;;  %v235_v25 = vld [vmem:[%s821_s4 + $0x10] sm:$0xff]  ;;  %v419_v27 = vld [vmem:[%s822_s5] sm:$0xff] }
   0x9   :  { %595 = vmatpush3.bf16.msra.mxu0 %v592_v7  ;;  %v236_v26 = vld [vmem:[%s821_s4 + $0x18] sm:$0xff]  ;;  %v420_v28 = vld [vmem:[%s822_s5 + $0x8] sm:$0xff]  ;;  %v237_v29 = vld [vmem:[%s821_s4 + $0x20] sm:$0xff] }
   0xa   :  { %v421_v30 = vld [vmem:[%s822_s5 + $0x10] sm:$0xff]  ;;  %v238_v31 = vld [vmem:[%s821_s4 + $0x28] sm:$0xff]  ;;  %v422_v32 = vld [vmem:[%s822_s5 + $0x18] sm:$0xff] }
   0xb   :  { %74 = vperm.xlu1 %622, %v44_v15   ;;  %v239_v33 = vld [vmem:[%s821_s4 + $0x30] sm:$0xff]  ;;  %v423_v34 = vld [vmem:[%s822_s5 + $0x20] sm:$0xff]  ;;  %v240_v35 = vld [vmem:[%s821_s4 + $0x38] sm:$0xff] }
   0xc   :  { %549 = vmatmul.mubr.msk.f32.vlgmr.msra.gmra.mrb[0].mxu0 %vm87_vm0, %v32_v12  ;;  %69 = vperm.xlu0 %621, %v43_v14   ;;  %v424_v36 = vld [vmem:[%s822_s5 + $0x28] sm:$0xff]  ;;  %v425_v37 = vld [vmem:[%s822_s5 + $0x30] sm:$0xff]  ;;  %v426_v38 = vld [vmem:[%s822_s5 + $0x38] sm:$0xff] }
   0xd   :  { %551 = vmatprep.mubr.msk.f32.mxu0 %vm87_vm0, %v33_v13  ;;  %v225_v39 = vld [vmem:[%s823_s3] sm:$0xff]  ;;  %v227_v40 = vld [vmem:[%s823_s3 + $0x10] sm:$0xff]  ;;  %v226_v13 = vld [vmem:[%s823_s3 + $0x8] sm:$0xff] }
   0xe   :  { %579 = vmatprep.mubr.msk.f32.mxu1 %vm281_vm1, %v227_v40  ;;  %v228_v14 = vld [vmem:[%s823_s3 + $0x18] sm:$0xff]  ;;  %v229_v15 = vld [vmem:[%s823_s3 + $0x20] sm:$0xff] }
   0xf   :  { %84 = vperm.xlu1 %622, %v46_v19  }
  0x10   :  { %552 = vmatmul.mubr.msk.f32.gmra.mrb[2].mxu0 %vm87_vm0, %v34_v16  ;;  %79 = vperm.xlu0 %621, %v45_v18   ;;  %v230_v16 = vld [vmem:[%s823_s3 + $0x28] sm:$0xff]  ;;  %v232_v18 = vld [vmem:[%s823_s3 + $0x38] sm:$0xff] }
  0x11   :  { %554 = vmatprep.mubr.msk.f32.mxu0 %vm87_vm0, %v35_v17  ;;  %v231_v17 = vld [vmem:[%s823_s3 + $0x30] sm:$0xff] }
  0x13   :  { %248 = vperm.xlu1 %622, %v234_v23  }
  0x14   :  { %555 = vmatmul.mubr.msk.f32.gmra.mrb[4].mxu0 %vm87_vm0, %v36_v20  ;;  %243 = vperm.xlu0 %621, %v233_v22  }
  0x15   :  { %557 = vmatprep.mubr.msk.f32.mxu0 %vm87_vm0, %v37_v21 }
  0x17   :  { %258 = vperm.xlu1 %622, %v236_v26  }
  0x18   :  { %558 = vmatmul.mubr.msk.f32.gmra.mrb[6].mxu0 %vm87_vm0, %v38_v24  ;;  %253 = vperm.xlu0 %621, %v235_v25  }
  0x19   :  { %576 = vmatprep.mubr.msk.f32.mxu0 %vm281_vm1, %v225_v39 }
  0x1b   :  { %434 = vperm.xlu1 %622, %v420_v28  }
  0x1c   :  { %429 = vperm.xlu0 %621, %v419_v27  }
  0x1f   :  { %439 = vperm.xlu1 %622, %v421_v30  }
  0x20   :  { %263 = vperm.xlu0 %621, %v237_v29  }
  0x23   :  { %444 = vperm.xlu1 %622, %v422_v32  }
  0x24   :  { %268 = vperm.xlu0 %621, %v238_v31  }
  0x27   :  { %449 = vperm.xlu1 %622, %v423_v34  }
  0x28   :  { %273 = vperm.xlu0 %621, %v239_v33  }
  0x2b   :  { %454 = vperm.xlu1 %622, %v424_v36  }
  0x2c   :  { %278 = vperm.xlu0 %621, %v240_v35  }
  0x2f   :  { %464 = vperm.xlu1 %622, %v426_v38  }
  0x30   :  { %459 = vperm.xlu0 %621, %v425_v37  }
  0x82   :  { %v60_v42 = vpop.permute.xlu1 %59 }
  0x83   :  { %v50_v41 = vpop.permute.xlu0 %49 }
  0x86   :  { %v65_v44 = vpop.permute.xlu1 %64 }
  0x87   :  { %v55_v43 = vpop.permute.xlu0 %54 }
  0x8a   :  { %v75_v54 = vpop.permute.xlu1 %74 }
  0x8b   :  { %v70_v57 = vpop.permute.xlu0 %69 }
  0x8e   :  { %v85_v2 = vpop.permute.xlu1 %84 }
  0x8f   :  { %v80_v5 = vpop.permute.xlu0 %79 }
  0x92   :  { %v249_v20 = vpop.permute.xlu1 %248 }
  0x93   :  { %v244_v19 = vpop.permute.xlu0 %243 }
  0x96   :  { %v259_v22 = vpop.permute.xlu1 %258 }
  0x97   :  { %v254_v21 = vpop.permute.xlu0 %253 }
  0x9a   :  { %v435_v24 = vpop.permute.xlu1 %434 }
  0x9b   :  { %v430_v23 = vpop.permute.xlu0 %429 }
  0x9e   :  { %v440_v26 = vpop.permute.xlu1 %439 }
  0x9f   :  { %v264_v25 = vpop.permute.xlu0 %263 }
  0xa2   :  { %v445_v28 = vpop.permute.xlu1 %444 }
  0xa3   :  { %v269_v27 = vpop.permute.xlu0 %268 }
  0xa7   :  { %v274_v37 = vpop.permute.xlu0 %273 }
  0xdf   :  { %v550_v45 = vpop.f32.mrb[0].mxu0 }
  0xe0   :  { %v184_v46 = vadd.f32 %v550_v45, %v55_v43  ;;  %v178_v47 = vpop.f32.mrb[1].mxu0 }
  0xe1   :  { %v179_v48 = vadd.f32 %v178_v47, %v50_v41 }
  0xe2   :  { %v218_v49 = vmax.f32 %v184_v46, 0.0 }
  0xe3   :  { %v217_v50 = vmax.f32 %v179_v48, 0.0  ;;  %v553_v51 = vpop.f32.mrb[2].mxu0 }
  0xe4   :  { %v194_v52 = vadd.f32 %v553_v51, %v65_v44  ;;  %v188_v53 = vpop.f32.mrb[3].mxu0 }
  0xe5   :  { %v596_v55 = vpack.c.bf16 %v218_v49, %v217_v50  ;;  %v189_v56 = vadd.f32 %v188_v53, %v60_v42  ;;  %v450_v42 = vpop.permute.xlu1 %449  ;;  %v279_v53 = vpop.permute.xlu0 %278 }
  0xe6   :  { %v220_v58 = vmax.f32 %v194_v52, 0.0 }
  0xe7   :  { %v219_v59 = vmax.f32 %v189_v56, 0.0  ;;  %v556_v60 = vpop.f32.mrb[4].mxu0  ;;  %597 = vmatprep.subr.bf16.mxu0 %v596_v55  ;;  %612 = vmatprep.subr.bf16.mxu1 %v596_v55 }
  0xe8   :  { %v204_v61 = vadd.f32 %v556_v60, %v75_v54  ;;  %v198_v62 = vpop.f32.mrb[5].mxu0  ;;  %599 = vmatpush3.bf16.msra.mxu0 %v596_v55  ;;  %616 = vmatpush3.bf16.msra.mxu1 %v596_v55 }
  0xe9   :  { %v600_v63 = vpack.c.bf16 %v220_v58, %v219_v59  ;;  %v199_v0 = vadd.f32 %v198_v62, %v70_v57  ;;  %v455_v60 = vpop.permute.xlu1 %454 }
  0xea   :  { %v222_v1 = vmax.f32 %v204_v61, 0.0 }
  0xeb   :  { %v221_v3 = vmax.f32 %v199_v0, 0.0  ;;  %v559_v4 = vpop.f32.mrb[6].mxu0  ;;  %601 = vmatprep.subr.bf16.mxu0 %v600_v63  ;;  %613 = vmatprep.subr.bf16.mxu1 %v600_v63 }
  0xec   :  { %v214_v6 = vadd.f32 %v559_v4, %v85_v2  ;;  %v208_v7 = vpop.f32.mrb[7].mxu0  ;;  %603 = vmatpush3.bf16.msra.mxu0 %v600_v63  ;;  %617 = vmatpush3.bf16.msra.mxu1 %v600_v63 }
  0xed   :  { %v604_v8 = vpack.c.bf16 %v222_v1, %v221_v3  ;;  %v209_v9 = vadd.f32 %v208_v7, %v80_v5  ;;  %v460_v3 = vpop.permute.xlu0 %459 }
  0xee   :  { %v224_v10 = vmax.f32 %v214_v6, 0.0  ;;  %v465_v6 = vpop.permute.xlu1 %464 }
  0xef   :  { %v223_v11 = vmax.f32 %v209_v9, 0.0  ;;  %605 = vmatprep.subr.bf16.mxu0 %v604_v8  ;;  %614 = vmatprep.subr.bf16.mxu1 %v604_v8 }
  0xf0   :  { %607 = vmatpush3.bf16.msra.mxu0 %v604_v8  ;;  %618 = vmatpush3.bf16.msra.mxu1 %v604_v8 }
  0xf1   :  { %v608_v12 = vpack.c.bf16 %v224_v10, %v223_v11 }
  0xf3   :  { %609 = vmatprep.subr.bf16.mxu0 %v608_v12  ;;  %615 = vmatprep.subr.bf16.mxu1 %v608_v12 }
  0xf4   :  { %611 = vmatpush3.bf16.msra.mxu0 %v608_v12  ;;  %619 = vmatpush3.bf16.msra.mxu1 %v608_v12 }
  0xf7   :  { %577 = vmatmul.mubr.msk.f32.vlgmr.msra.gmra.mrb[8].mxu0 %vm281_vm1, %v226_v13  ;;  %580 = vmatmul.mubr.msk.f32.vlgmr.msra.gmra.mrb[0].mxu1 %vm281_vm1, %v228_v14 }
  0xf8   :  { %582 = vmatprep.mubr.msk.f32.mxu1 %vm281_vm1, %v229_v15  ;;  %v489_v15 = vstv %s824_s6 }
  0xfb   :  { %583 = vmatmul.mubr.msk.f32.gmra.mrb[2].mxu1 %vm281_vm1, %v230_v16 }
  0xfc   :  { %585 = vmatprep.mubr.msk.f32.mxu1 %vm281_vm1, %v231_v17 }
  0xff   :  { %586 = vmatmul.mubr.msk.f32.gmra.mrb[4].mxu1 %vm281_vm1, %v232_v18 }
 0x1ca   :  { %v578_v29 = vpop.f32.mrb[8].mxu0  ;;  %v581_v30 = vpop.f32.mrb[0].mxu1 }
 0x1cb   :  { %v378_v31 = vadd.f32 %v578_v29, %v249_v20  ;;  %v388_v32 = vadd.f32 %v581_v30, %v259_v22  ;;  %v372_v33 = vpop.f32.mrb[9].mxu0  ;;  %v382_v34 = vpop.f32.mrb[1].mxu1 }
 0x1cc   :  { %v373_v35 = vadd.f32 %v372_v33, %v244_v19  ;;  %v383_v36 = vadd.f32 %v382_v34, %v254_v21 }
 0x1cd   :  { %v412_v38 = vmax.f32 %v378_v31, 0.0  ;;  %v414_v44 = vmax.f32 %v388_v32, 0.0 }
 0x1ce   :  { %v411_v39 = vmax.f32 %v373_v35, 0.0  ;;  %v413_v40 = vmax.f32 %v383_v36, 0.0  ;;  %v584_v41 = vpop.f32.mrb[2].mxu1 }
 0x1cf   :  { %v468_v43 = vmul.f32 %v435_v24, %v412_v38  ;;  %v392_v45 = vpop.f32.mrb[3].mxu1  ;;  %v398_v47 = vadd.f32 %v584_v41, %v269_v27  ;;  %v470_v54 = vmul.f32 %v445_v28, %v414_v44 }
 0x1d0   :  { %v467_v46 = vmul.f32 %v430_v23, %v411_v39  ;;  %v393_v48 = vadd.f32 %v392_v45, %v264_v25  ;;  %v469_v50 = vmul.f32 %v440_v26, %v413_v40 }
 0x1d1   :  { %v416_v57 = vmax.f32 %v398_v47, 0.0 }
 0x1d2   :  { %v475_v49 = vadd.f32 %v468_v43, %v467_v46  ;;  %v415_v51 = vmax.f32 %v393_v48, 0.0  ;;  %v587_v52 = vpop.f32.mrb[4].mxu1 }
 0x1d3   :  { %v402_v55 = vpop.f32.mrb[5].mxu1  ;;  %v408_v58 = vadd.f32 %v587_v52, %v279_v53  ;;  %v472_v0 = vmul.f32 %v455_v60, %v416_v57 }
 0x1d4   :  { %v476_v56 = vadd.f32 %v475_v49, %v469_v50  ;;  %v403_v59 = vadd.f32 %v402_v55, %v274_v37  ;;  %v471_v61 = vmul.f32 %v450_v42, %v415_v51 }
 0x1d5   :  { %v418_v2 = vmax.f32 %v408_v58, 0.0 }
 0x1d6   :  { %v477_v62 = vadd.f32 %v476_v56, %v470_v54  ;;  %v417_v63 = vmax.f32 %v403_v59, 0.0 }
 0x1d7   :  { %v474_v7 = vmul.f32 %v465_v6, %v418_v2 }
 0x1d8   :  { %v478_v1 = vadd.f32 %v477_v62, %v471_v61  ;;  %v473_v4 = vmul.f32 %v460_v3, %v417_v63 }
 0x1da   :  { %v479_v5 = vadd.f32 %v478_v1, %v472_v0 }
 0x1dc   :  { %v480_v8 = vadd.f32 %v479_v5, %v473_v4 }
 0x1de   :  { %v481_v9 = vadd.f32 %v480_v8, %v474_v7 }
 0x1e0   :  { %v482_v10 = vrot.slane %v481_v9, 4 }
 0x1e2   :  { %v483_v11 = vadd.f32 %v482_v10, %v481_v9 }
 0x1e4   :  { %v484_v12 = vrot.slane %v483_v11, 2 }
 0x1e6   :  { %v485_v13 = vadd.f32 %v484_v12, %v483_v11 }
 0x1e8   :  { %v486_v14 = vrot.slane %v485_v13, 1 }
 0x1ea   :  { %v487_v16 = vadd.f32 %v486_v14, %v485_v13 }
 0x1ec   :  { %v490_v17 = vadd.f32 %v489_v15, %v487_v16 }
 0x1ee   :  { %491 = vst [vmem:[%s825_s7] sm:$0x1] %v490_v17 }

</bundles_post_ra>
